<compile_context>
chip_gen: v6e
topology: v6e:2x2x1
jax: 0.10.0
libtpu: 0.0.40
codegen_flags: <defaults>
</compile_context>

<pallas_src>
import functools

import jax
import jax.numpy as jnp
import numpy as np
from jax import lax
from jax.experimental import pallas as pl
from jax.experimental.pallas import tpu as pltpu


def _round_up(x, m):
    return -(-x // m) * m


def _default_compute_dtype():
    """bf16 operands on v6e/v7x (native wide bf16 MXU/VPU); f32 on v5e/other."""
    try:
        kind = jax.devices()[0].device_kind.lower()
    except Exception:
        return jnp.float32
    return jnp.bfloat16 if ("v6" in kind or "v7" in kind) else jnp.float32


def _vmem_limit_bytes():
    """Scoped-VMEM request with headroom (v7x has only 64 MiB per TC)."""
    try:
        phys = int(getattr(pltpu.get_tpu_info(), "vmem_capacity_bytes", 128 << 20))
    except Exception:
        phys = 128 << 20
    if phys >= (128 << 20):                      # v5e / v6e
        return 64 << 20
    return int(min(40 << 20, (phys * 5) // 8))   # v7x: never request all of VMEM


def _wn_conv_kernel(x_ref, w_ref, b_ref, o_ref, *, kh_sz, stride, h_out):
    """One grid step = `batch_tile` images.

    x_ref: (BT, Hp, Wp*Cin)          channel-folded, spatially padded input
    w_ref: (KH, Wp*Cin, Wout*Cout)   block-Toeplitz, normalized weight
    b_ref: (1, Wout*Cout)            bias tiled over Wout (f32)
    o_ref: (BT, Hout, Wout*Cout)     output (real data only, no lane padding)
    """
    bt = x_ref.shape[0]
    n_lanes = w_ref.shape[2]

    # Bias folded into the accumulator init (one broadcast, hoisted out of loop).
    acc = jnp.broadcast_to(b_ref[...], (bt * h_out, n_lanes))      # f32

    for kh in range(kh_sz):                        # static: KH lane-dense matmuls
        if stride == 1:
            rows = x_ref[:, kh:kh + h_out, :]      # contiguous sublane slice
        else:
            # TODO(synk): for stride>1, pre-gather rows in the wrapper to avoid
            # the in-kernel strided sublane slice (XLU-heavy on v5e).
            x = x_ref[...]
            rows = lax.slice(x, (0, kh, 0),
                             (bt, kh + (h_out - 1) * stride + 1, x.shape[2]),
                             (1, stride, 1))
        lhs = rows.reshape(bt * h_out, -1)         # minor dim untouched: free
        acc = acc + jnp.dot(lhs, w_ref[kh], preferred_element_type=jnp.float32)

    o_ref[...] = acc.reshape(bt, h_out, n_lanes).astype(o_ref.dtype)


def weight_norm_conv2d(x_nchw, v, bias, *, stride=1, padding=0,
                       compute_dtype=None, batch_tile=None):
    """x_nchw: (N, Cin, H, W); v: (Cout, Cin, KH, KW); bias: (Cout,).

    Returns (N, Cout, Hout, Wout) matching
    F.conv2d(x, v / ||v||_per_out_channel, bias, stride, padding).
    """
    n, cin, h, w = x_nchw.shape
    cout, cin_v, kh_sz, kw_sz = v.shape
    assert cin == cin_v
    out_dtype = x_nchw.dtype
    if compute_dtype is None:
        compute_dtype = _default_compute_dtype()

    hp, wp = h + 2 * padding, w + 2 * padding
    h_out = (hp - kh_sz) // stride + 1
    w_out = (wp - kw_sz) // stride + 1
    wpc = wp * cin
    n_lanes = w_out * cout                 # output minor dim, (ow major, co minor)

    # --- weight normalization (g == 1), hoisted out of the grid loop ---
    # A zero-norm filter gives inf/NaN, matching PyTorch weight_norm's 1/0.
    v32 = v.astype(jnp.float32)
    inv_norm = lax.rsqrt(jnp.sum(v32 * v32, axis=(1, 2, 3), keepdims=True))
    w_eff = v32 * inv_norm                                 # (Cout, Cin, KH, KW)

    # --- block-Toeplitz RHS:  T[kh, wi*Cin+c, ow*Cout+co] =
    #         w_eff[co, c, kh, wi - ow*stride]   (0 outside [0, KW)) ---
    # NOTE(scaling): Toeplitz RHS is O(Wp*Cin * Wout*Cout); ideal at these
    # widths.  TODO(synk): tile Wout on an extra grid axis if W/Cout grow large.
    w_tap = jnp.transpose(w_eff, (2, 3, 1, 0))             # (KH, KW, Cin, Cout)
    rel = jnp.arange(wp)[None, :] - jnp.arange(w_out)[:, None] * stride  # (Wout, Wp)
    valid = (rel >= 0) & (rel < kw_sz)
    gathered = jnp.take(w_tap, jnp.clip(rel, 0, kw_sz - 1), axis=1)  # (KH,Wout,Wp,Cin,Cout)
    gathered = jnp.where(valid[None, :, :, None, None], gathered, 0.0)
    w_toe = jnp.transpose(gathered, (0, 2, 3, 1, 4)).reshape(kh_sz, wpc, n_lanes)
    w_toe = w_toe.astype(compute_dtype)

    b_row = jnp.tile(bias.astype(jnp.float32), w_out).reshape(1, n_lanes)

    # --- channel-folded, spatially padded, lane-dense input: (N, Hp, Wp*Cin) ---
    x_nhwc = jnp.transpose(x_nchw, (0, 2, 3, 1)).astype(compute_dtype)
    x_pad = jnp.pad(x_nhwc, ((0, 0), (padding, padding), (padding, padding), (0, 0)))
    x_folded = x_pad.reshape(n, hp, wpc)

    # --- VMEM budget (lane/sublane-rounded) and batch_tile (grid >= 2 steps) ---
    vmem_limit = _vmem_limit_bytes()
    c_isz = np.dtype(compute_dtype).itemsize
    o_isz = np.dtype(out_dtype).itemsize
    sub_c = 8 * (4 // c_isz)                     # 8 sublanes f32, 16 for bf16
    lanes_in = _round_up(wpc, 128)
    lanes_out = _round_up(n_lanes, 128)
    per_img = (2 * _round_up(hp, sub_c) * lanes_in * c_isz                     # x, x2 bufs
               + 2 * _round_up(h_out, 8 * (4 // o_isz)) * lanes_out * o_isz    # out, x2 bufs
               + kh_sz * _round_up(h_out, sub_c) * lanes_in * c_isz            # LHS temps
               + _round_up(h_out, 8) * lanes_out * 4)                          # f32 acc
    fixed = (2 * kh_sz * _round_up(wpc, sub_c) * lanes_out * c_isz             # Toeplitz, x2
             + 2 * 8 * lanes_out * 4                                           # bias
             + (4 << 20))                                                      # compiler slack
    budget = max(vmem_limit - fixed, per_img)

    if batch_tile is None:
        batch_tile = 1
        min_grid = 2 if n >= 2 else 1            # keep both v7x TCs busy
        for bt in range(n, 0, -1):
            if n % bt or (n // bt) < min_grid:
                continue
            if bt * per_img <= budget:
                batch_tile = bt
                break
    assert n % batch_tile == 0
    grid = (n // batch_tile,)
    # TODO(synk): if a single image ever exceeds the budget (very large H), add
    # a halo'd H-tiling grid axis instead of relying on batch_tile=1.

    kernel = functools.partial(_wn_conv_kernel, kh_sz=kh_sz, stride=stride,
                               h_out=h_out)

    flops = 2 * n * kh_sz * h_out * wpc * n_lanes          # actual MXU work
    bytes_accessed = (x_folded.size * c_isz + w_toe.size * c_isz
                      + b_row.size * 4 + n * h_out * n_lanes * o_isz)

    out = pl.pallas_call(
        kernel,
        out_shape=jax.ShapeDtypeStruct((n, h_out, n_lanes), out_dtype),
        grid_spec=pltpu.PrefetchScalarGridSpec(
            num_scalar_prefetch=0,
            grid=grid,
            in_specs=[
                pl.BlockSpec((batch_tile, hp, wpc), lambda b: (b, 0, 0)),
                pl.BlockSpec((kh_sz, wpc, n_lanes), lambda b: (0, 0, 0)),
                pl.BlockSpec((1, n_lanes), lambda b: (0, 0)),
            ],
            out_specs=pl.BlockSpec((batch_tile, h_out, n_lanes),
                                   lambda b: (b, 0, 0)),
        ),
        compiler_params=pltpu.CompilerParams(
            dimension_semantics=("parallel",),
            vmem_limit_bytes=int(vmem_limit)),
        cost_estimate=pl.CostEstimate(flops=int(flops), transcendentals=0,
                                      bytes_accessed=int(bytes_accessed)),
    )(x_folded, w_toe, b_row)

    out = out.reshape(n, h_out, w_out, cout)       # split (ow, co): metadata only
    return jnp.transpose(out, (0, 3, 1, 2))        # NHWC -> NCHW (module layout)


def _reference(x_nchw, v, bias, *, stride, padding):
    """Pure-JAX reference (lax conv) for correctness check."""
    norm = jnp.sqrt(jnp.sum(v.astype(jnp.float32) ** 2,
                            axis=(1, 2, 3), keepdims=True))
    w_eff = v / norm
    y = lax.conv_general_dilated(
        x_nchw.astype(jnp.float32), w_eff.astype(jnp.float32),
        window_strides=(stride, stride),
        padding=[(padding, padding), (padding, padding)],
        dimension_numbers=("NCHW", "OIHW", "NCHW"))
    return y + bias.reshape(1, -1, 1, 1)


if __name__ == "__main__":
    # Small shapes consistent with the module: N=2, Cin=4, H=W=16,
    # Cout=8, kernel=3, stride=1, padding=1.
    key = jax.random.PRNGKey(0)
    kx, kv, kb = jax.random.split(key, 3)

    N, CIN, H, W = 2, 4, 16, 16
    COUT, K = 8, 3
    STRIDE, PAD = 1, 1

    x = jax.random.normal(kx, (N, CIN, H, W), dtype=jnp.float32)
    v = jax.random.normal(kv, (COUT, CIN, K, K), dtype=jnp.float32) * 0.1
    bias = jax.random.normal(kb, (COUT,), dtype=jnp.float32) * 0.1

    y_ref = _reference(x, v, bias, stride=STRIDE, padding=PAD)

    # f32 operands: matches PyTorch module numerics (v5e default path).
    y32 = jax.block_until_ready(
        weight_norm_conv2d(x, v, bias, stride=STRIDE, padding=PAD,
                           compute_dtype=jnp.float32))
    np.testing.assert_allclose(np.asarray(y32), np.asarray(y_ref),
                               rtol=1e-4, atol=1e-4)

    # bf16 operands + f32 accumulation (v6e/v7x default path).
    ybf = jax.block_until_ready(
        weight_norm_conv2d(x, v, bias, stride=STRIDE, padding=PAD,
                           compute_dtype=jnp.bfloat16))
    np.testing.assert_allclose(np.asarray(ybf), np.asarray(y_ref),
                               rtol=5e-2, atol=5e-2)

    # Auto (chip-dependent) compute dtype.
    ydef = jax.block_until_ready(
        weight_norm_conv2d(x, v, bias, stride=STRIDE, padding=PAD))
    tol = 1e-4 if _default_compute_dtype() == jnp.float32 else 5e-2
    np.testing.assert_allclose(np.asarray(ydef), np.asarray(y_ref),
                               rtol=tol, atol=tol)

    print("KERNEL_OK")
</pallas_src>

<mosaic_0001>
module attributes {stable_mosaic.version = 11 : i64} {
  func.func @_wn_conv_kernel(%arg0: i32, %arg1: memref<1x18x72xf32, #tpu.memory_space<vmem>>, %arg2: memref<3x72x128xf32, #tpu.memory_space<vmem>>, %arg3: memref<1x128xf32, #tpu.memory_space<vmem>>, %arg4: memref<1x16x128xf32, #tpu.memory_space<vmem>>) attributes {dimension_semantics = [#tpu.dimension_semantics<parallel>], iteration_bounds = array<i64: 2>, scalar_prefetch = 0 : i64, scratch_operands = 0 : i64, tpu.core_type = #tpu.core_type<tc>, window_params = [{transform_indices = @transform_0, window_bounds = array<i64: 1, 18, 72>}, {pipeline_mode = #tpu.pipeline_mode<synchronous>, transform_indices = @transform_1, window_bounds = array<i64: 3, 72, 128>}, {pipeline_mode = #tpu.pipeline_mode<synchronous>, transform_indices = @transform_2, window_bounds = array<i64: 1, 128>}, {transform_indices = @transform_3, window_bounds = array<i64: 1, 16, 128>}]} {
    %c0 = arith.constant 0 : index
    %c0_0 = arith.constant 0 : index
    %0 = vector.load %arg3[%c0, %c0_0] : memref<1x128xf32, #tpu.memory_space<vmem>>, vector<1x128xf32>
    %1 = vector.shape_cast %0 : vector<1x128xf32> to vector<1x128xf32>
    %2 = vector.broadcast %1 : vector<1x128xf32> to vector<16x128xf32>
    %c0_1 = arith.constant 0 : index
    %c0_2 = arith.constant 0 : index
    %c0_3 = arith.constant 0 : index
    %3 = vector.load %arg1[%c0_1, %c0_2, %c0_3] : memref<1x18x72xf32, #tpu.memory_space<vmem>>, vector<1x16x72xf32>
    %4 = vector.shape_cast %3 : vector<1x16x72xf32> to vector<16x72xf32>
    %c0_4 = arith.constant 0 : index
    %c0_5 = arith.constant 0 : index
    %c0_6 = arith.constant 0 : index
    %5 = vector.load %arg2[%c0_4, %c0_5, %c0_6] : memref<3x72x128xf32, #tpu.memory_space<vmem>>, vector<1x72x128xf32>
    %6 = vector.shape_cast %5 : vector<1x72x128xf32> to vector<72x128xf32>
    %cst = arith.constant dense<0.000000e+00> : vector<16x128xf32>
    %7 = tpu.matmul %4, %6, %cst {dimension_numbers = #tpu.dot_dimension_numbers<[1], [0], [0], [1], [0, 0, 1, 1], [], []>} : vector<16x72xf32>, vector<72x128xf32>, vector<16x128xf32> -> vector<16x128xf32>
    %8 = arith.addf %2, %7 : vector<16x128xf32>
    %c0_7 = arith.constant 0 : index
    %c1 = arith.constant 1 : index
    %c0_8 = arith.constant 0 : index
    %9 = vector.load %arg1[%c0_7, %c1, %c0_8] : memref<1x18x72xf32, #tpu.memory_space<vmem>>, vector<1x16x72xf32>
    %10 = vector.shape_cast %9 : vector<1x16x72xf32> to vector<16x72xf32>
    %c1_9 = arith.constant 1 : index
    %c0_10 = arith.constant 0 : index
    %c0_11 = arith.constant 0 : index
    %11 = vector.load %arg2[%c1_9, %c0_10, %c0_11] : memref<3x72x128xf32, #tpu.memory_space<vmem>>, vector<1x72x128xf32>
    %12 = vector.shape_cast %11 : vector<1x72x128xf32> to vector<72x128xf32>
    %cst_12 = arith.constant dense<0.000000e+00> : vector<16x128xf32>
    %13 = tpu.matmul %10, %12, %cst_12 {dimension_numbers = #tpu.dot_dimension_numbers<[1], [0], [0], [1], [0, 0, 1, 1], [], []>} : vector<16x72xf32>, vector<72x128xf32>, vector<16x128xf32> -> vector<16x128xf32>
    %14 = arith.addf %8, %13 : vector<16x128xf32>
    %c0_13 = arith.constant 0 : index
    %c2 = arith.constant 2 : index
    %c0_14 = arith.constant 0 : index
    %15 = vector.load %arg1[%c0_13, %c2, %c0_14] : memref<1x18x72xf32, #tpu.memory_space<vmem>>, vector<1x16x72xf32>
    %16 = vector.shape_cast %15 : vector<1x16x72xf32> to vector<16x72xf32>
    %c2_15 = arith.constant 2 : index
    %c0_16 = arith.constant 0 : index
    %c0_17 = arith.constant 0 : index
    %17 = vector.load %arg2[%c2_15, %c0_16, %c0_17] : memref<3x72x128xf32, #tpu.memory_space<vmem>>, vector<1x72x128xf32>
    %18 = vector.shape_cast %17 : vector<1x72x128xf32> to vector<72x128xf32>
    %cst_18 = arith.constant dense<0.000000e+00> : vector<16x128xf32>
    %19 = tpu.matmul %16, %18, %cst_18 {dimension_numbers = #tpu.dot_dimension_numbers<[1], [0], [0], [1], [0, 0, 1, 1], [], []>} : vector<16x72xf32>, vector<72x128xf32>, vector<16x128xf32> -> vector<16x128xf32>
    %20 = arith.addf %14, %19 : vector<16x128xf32>
    %21 = vector.shape_cast %20 : vector<16x128xf32> to vector<1x16x128xf32>
    %c0_19 = arith.constant 0 : index
    %c0_20 = arith.constant 0 : index
    %c0_21 = arith.constant 0 : index
    %22 = vector.load %arg4[%c0_19, %c0_20, %c0_21] : memref<1x16x128xf32, #tpu.memory_space<vmem>>, vector<1x16x128xf32>
    tpu.vector_store %arg4[%c0_19, %c0_20, %c0_21], %21 {strides = array<i32>} : memref<1x16x128xf32, #tpu.memory_space<vmem>>, vector<1x16x128xf32>,
    return
  }
  func.func @transform_0(%arg0: i32) -> (i32, i32, i32) {
    %c0_i32 = arith.constant 0 : i32
    %c0_i32_0 = arith.constant 0 : i32
    %c0_i32_1 = arith.constant 0 : i32
    return %arg0, %c0_i32, %c0_i32_0 : i32, i32, i32
  }
  func.func @transform_1(%arg0: i32) -> (i32, i32, i32) {
    %c0_i32 = arith.constant 0 : i32
    %c0_i32_0 = arith.constant 0 : i32
    %c0_i32_1 = arith.constant 0 : i32
    %c0_i32_2 = arith.constant 0 : i32
    return %c0_i32, %c0_i32_0, %c0_i32_1 : i32, i32, i32
  }
  func.func @transform_2(%arg0: i32) -> (i32, i32) {
    %c0_i32 = arith.constant 0 : i32
    %c0_i32_0 = arith.constant 0 : i32
    %c0_i32_1 = arith.constant 0 : i32
    return %c0_i32, %c0_i32_0 : i32, i32
  }
  func.func @transform_3(%arg0: i32) -> (i32, i32, i32) {
    %c0_i32 = arith.constant 0 : i32
    %c0_i32_0 = arith.constant 0 : i32
    %c0_i32_1 = arith.constant 0 : i32
    return %arg0, %c0_i32, %c0_i32_0 : i32, i32, i32
  }
}

</mosaic_0001>

<bundles_post_ra>
// kernel: tpu_custom_call.1
= control target key start
LH: loop header
LB: loop body
LE: loop exit
PB: predicated region body
PF: predicated region fallthrough
CT: control target
= control target key end

     0   :  { %8 = vsyncpa [#allocation3], 0  ;;  %s993_s0 = inlined_call_operand.vmem [shape: f32[2,18,72], index: 0, kind: input, shape index: {}]   ;;  %s994_s1 = inlined_call_operand.hbm [shape: f32[3,72,128], index: 1, kind: input, shape index: {}]   ;;  %s995_s2 = inlined_call_operand.vmem [shape: f32[1,128], index: 2, kind: input, shape index: {}]   ;;  %s996_s3 = inlined_call_operand.hbm [shape: f32[2,16,128], index: 3, kind: output, shape index: {}]  }
   0x1   :  { %9 = vsyncpa [#allocation4], 0 }
   0x2   :  { %11 = vsyncpa [#allocation4 + $0x1], 0  ;;  %s856_s12 = smov 0   ;;  %s858_s13 = smov 0  }
   0x3   :  { %s860_s14 = smov 0   ;;  %s862_s15 = smov 0  }
   0x4 LB: > { %s877_s16 = sadd.s32 4294967295, %s828_s15   ;;  %s566_s17 = sadd.s32 4294967294, %s828_s15   ;;  %s828_s15 = sphi %s862_s15, %s1004_s15   ;;  %s824_s14 = sphi %s860_s14, %s1003_s14   ;;  %s820_s13 = sphi %s858_s13, %s1002_s13   ;;  %s816_s12 = sphi %s856_s12, %s1001_s12  }
   0x5   : > { %s881_s18 = sadd.s32 1, %s828_s15   ;;  %s92_s19 = sadd.s32 1, %s824_s14 }
   0x6   : > { %s89_s20 = ssub.s32 %s828_s15, %s881_s18  ;;  %p102_p0 = scmp.ne.s32.totalorder %s824_s14, %s820_s13 }
   0x7   : > { %p90_p1 = scmp.eq.s32.totalorder %s89_s20, 0  ;;  %p103_p2 = scmp.eq.s32.totalorder %s877_s16, 1 }
   0x8   : > { %p108_p3 = scmp.ne.s32.totalorder %s820_s13, %s816_s12  ;;  %p109_p4 = scmp.eq.s32.totalorder %s566_s17, 1 }
   0x9   : > { %s892_s21 = scalar_select %p90_p1, %s824_s14, %s92_s19  }
   0xa   : > { %p894_p5 = por %p103_p2, %p102_p0  ;;  %p898_p6 = por %p109_p4, %p108_p3 }
   0xb   : > { %p567_p7 = scmp.ge.s32.totalorder %s828_s15, 1  ;;  %p116_p8 = scmp.lt.s32.totalorder %s828_s15, 3 }
   0xc   : > { %s998_s23 = scalar_select %p898_p6, 1, 0 }
   0xd   : > { %p698_p9 = scmp.eq.s32.totalorder %s877_s16, 0  ;;  %p905_p10 = pnand %p567_p7, %p116_p8 }
   0xe   : > { %s830_s25 = smov [#allocation2]  }
   0xf   : > { %s128_s26 = sshll.u32 %s830_s25, 4  ;;  %p690_p11 = pneg %p905_p10  ;;  %s129_s26 = int_to_ptr.vmem [resolvable:$true] %s128_s26 }
  0x10   : > { %s749_s27 = scalar_lea.vmem %s129_s26, 3456  ;;  %p757_p3 = scmp.lt.s32.totalorder %s129_s26, %s129_s26 }
  0x11   : > { %p691_p12 = pnand %p698_p9, %p690_p11  ;;  %p750_p0 = scmp.ne.s32.totalorder %s129_s26, %s749_s27 }
  0x12   : > { %p758_p4 = scmp.lt.s32.totalorder %s749_s27, %s749_s27 }
  0x13   : > { %p740_p13 = pneg %p691_p12 }
  0x14   : > { %p759_p6 = por %p758_p4, %p757_p3 }
  0x15   : > { %p752_p1 = pnand %p750_p0, %p740_p13 }
  0x17   : > { %p753_p2 = pneg %p752_p1 }
  0x19   : > { %p760_p7 = pnand %p759_p6, %p753_p2 }
  0x1b   : > { %763 = shalt.err (!%p760_p7)
}
  0x1c   : > { %s831_s28 = smov 128   ;;  %s832_s29 = smov 8  }
  0x1d   : > { %693 = dma.hbm_to_vmem [thread:$0]  (!%p691_p12), %s994_s1, 3456, %s129_s26, [#allocation3], %s831_s28, %s831_s28, %s832_s29  }
  0x1e   : > { %155 = sbr.rel (%p905_p10) target bundleno = 285 (0x11d), region = 32 }
  0x23   : > { %807 = dma.done.wait (%p698_p9), [#allocation3], 3456  }
  0x24   : > { %809 = vsyncadd (%p698_p9), [#allocation3], 4294963840  ;;  %p179_p8 = scmp.lt.s32.totalorder %s877_s16, 1  ;;  %v201_v0 = vld [vmem:[#allocation2 + $0x40] sm:$0xff]  ;;  %v200_v1 = vld [vmem:[#allocation2 + $0x38] sm:$0xff]  ;;  %vm202_vm0 = vcmask 588800  }
  0x25   : > { %v297_v2 = vld [vmem:[#allocation2 + $0x88] sm:$0xff]  ;;  %620 = vmatprep.subr.mxu0 %v201_v0  ;;  %v296_v3 = vld [vmem:[#allocation2 + $0x80] sm:$0xff]  ;;  %v199_v4 = vld [vmem:[#allocation2 + $0x30] sm:$0xff]  ;;  %s176_s10 = sand.u32 1, %s820_s13   ;;  %s586_s25 = sshll.u32 %s877_s16, 8 }
  0x26   : > { %641 = vmatprep.subr.mxu1 %v297_v2  ;;  %621 = vmatpush3.msra.mxu0 %v201_v0  ;;  %v295_v5 = vld [vmem:[#allocation2 + $0x78] sm:$0xff]  ;;  %s180_s5 = scalar_select %p179_p8, %s877_s16, 1  ;;  %v198_v6 = vld [vmem:[#allocation2 + $0x28] sm:$0xff]  ;;  %v294_v7 = vld [vmem:[#allocation2 + $0x70] sm:$0xff] }
  0x27   : > { %642 = vmatpush3.msra.mxu1 %v297_v2  ;;  %622 = vmatprep.subr.mxu0 %v200_v1  ;;  %v197_v8 = vld [vmem:[#allocation2 + $0x20] sm:$0xff]  ;;  %v293_v9 = vld [vmem:[#allocation2 + $0x68] sm:$0xff]  ;;  %v196_v10 = vld [vmem:[#allocation2 + $0x18] sm:$0xff]  ;;  %s572_s19 = sshll.u32 %s176_s10, 4  ;;  %s951_s28 = scalar_lea.hbm %s996_s3, %s586_s25 }
  0x28   : > { %643 = vmatprep.subr.mxu1 %v296_v3  ;;  %623 = vmatpush3.msra.mxu0 %v200_v1  ;;  %s683_s6 = smul.u32 24, %s180_s5  ;;  %v292_v11 = vld [vmem:[#allocation2 + $0x60] sm:$0xff]  ;;  %v195_v12 = vld [vmem:[#allocation2 + $0x10] sm:$0xff]  ;;  %v291_v13 = vld [vmem:[#allocation2 + $0x58] sm:$0xff]  ;;  %s178_s20 = scalar_lea.vmem [#allocation5], %s572_s19 }
  0x29   : > { %644 = vmatpush3.msra.mxu1 %v296_v3  ;;  %624 = vmatprep.subr.mxu0 %v199_v4  ;;  %v194_v14 = vld [vmem:[#allocation2 + $0x8] sm:$0xff]  ;;  %v290_v15 = vld [vmem:[#allocation2 + $0x50] sm:$0xff]  ;;  %v193_v17 = vld [vmem:[#allocation2] sm:$0xff]  ;;  %s492_s24 = sshll.u32 %s178_s20, 4  ;;  %s953_s29 = scalar_lea.sflag [#allocation4], %s176_s10  ;;  %s946_s24 = int_to_ptr.vmem [resolvable:$true] %s492_s24 }
  0x2a   : > { %645 = vmatprep.subr.mxu1 %v295_v5  ;;  %625 = vmatpush3.msra.mxu0 %v199_v4  ;;  %s927_s9 = scalar_lea.vmem %s993_s0, %s683_s6  ;;  %v289_v18 = vld [vmem:[#allocation2 + $0x48] sm:$0xff]  ;;  %v392_v20 = vld [vmem:[#allocation2 + $0xd0] sm:$0xff]  ;;  %v390_v25 = vld [vmem:[#allocation2 + $0xc0] sm:$0xff]  ;;  %s764_s16 = scalar_lea.vmem %s946_s24, 256 }
  0x2b   : > { %646 = vmatpush3.msra.mxu1 %v295_v5  ;;  %626 = vmatprep.subr.mxu0 %v198_v6  ;;  %v191_v16 = vld [vmem:[%s927_s9] sm:$0xff]  ;;  %v192_v19 = vld [vmem:[%s927_s9 + $0x8] sm:$0xff]  ;;  %v389_v26 = vld [vmem:[#allocation2 + $0xb8] sm:$0xff]  ;;  %p765_p6 = scmp.ne.s32.totalorder %s946_s24, %s764_s16  ;;  %s833_s30 = smov [#allocation5]  }
  0x2c   : > { %647 = vmatprep.subr.mxu1 %v294_v7  ;;  %627 = vmatpush3.msra.mxu0 %v198_v6  ;;  %v286_v21 = vld [vmem:[%s927_s9 + $0x1] sm:$0xff]  ;;  %v287_v22 = vld [vmem:[%s927_s9 + $0x9] sm:$0xff]  ;;  %v385_v30 = vld [vmem:[#allocation2 + $0x98] sm:$0xff]  ;;  %s768_s4 = sshll.u32 %s833_s30, 4  ;;  %s769_s4 = int_to_ptr.vmem [resolvable:$false] %s768_s4 }
  0x2d   : > { %648 = vmatpush3.msra.mxu1 %v294_v7  ;;  %628 = vmatprep.subr.mxu0 %v197_v8  ;;  %v391_v23 = vld [vmem:[#allocation2 + $0xc8] sm:$0xff]  ;;  %v388_v27 = vld [vmem:[#allocation2 + $0xb0] sm:$0xff]  ;;  %v386_v29 = vld [vmem:[#allocation2 + $0xa0] sm:$0xff]  ;;  %p766_p9 = pnand %p765_p6, %p894_p5  ;;  %s770_s5 = scalar_lea.vmem %s769_s4, 512 }
  0x2e   : > { %649 = vmatprep.subr.mxu1 %v293_v9  ;;  %629 = vmatpush3.msra.mxu0 %v197_v8  ;;  %v381_v24 = vld [vmem:[%s927_s9 + $0x2] sm:$0xff]  ;;  %v384_v31 = vld [vmem:[#allocation2 + $0x90] sm:$0xff]  ;;  %v574_v34 = vld [vmem:[%s995_s2] ss:$0 sm:$0xff]  ;;  %p771_p11 = scmp.lt.s32.totalorder %s946_s24, %s769_s4  ;;  %p772_p12 = scmp.lt.s32.totalorder %s770_s5, %s764_s16 }
  0x2f   : > { %650 = vmatpush3.msra.mxu1 %v293_v9  ;;  %630 = vmatprep.subr.mxu0 %v196_v10  ;;  %v387_v28 = vld [vmem:[#allocation2 + $0xa8] sm:$0xff]  ;;  %p767_p10 = pneg %p766_p9 }
  0x30   : > { %651 = vmatprep.subr.mxu1 %v292_v11  ;;  %631 = vmatpush3.msra.mxu0 %v196_v10  ;;  %v382_v32 = vld [vmem:[%s927_s9 + $0xa] sm:$0xff]  ;;  %p773_p13 = por %p772_p12, %p771_p11 }
  0x31   : > { %652 = vmatpush3.msra.mxu1 %v292_v11  ;;  %632 = vmatprep.subr.mxu0 %v195_v12 }
  0x32   : > { %653 = vmatprep.subr.mxu1 %v291_v13  ;;  %633 = vmatpush3.msra.mxu0 %v195_v12  ;;  %p774_p0 = pnand %p773_p13, %p767_p10 }
  0x33   : > { %654 = vmatpush3.msra.mxu1 %v291_v13  ;;  %634 = vmatprep.subr.mxu0 %v194_v14 }
  0x34   : > { %655 = vmatprep.subr.mxu1 %v290_v15  ;;  %635 = vmatpush3.msra.mxu0 %v194_v14 }
  0x35   : > { %638 = vmatprep.mubr.msk.f32.mxu0 %vm202_vm0, %v191_v16  ;;  %636 = vmatprep.subr.mxu0 %v193_v17 }
  0x36   : > { %656 = vmatpush3.msra.mxu1 %v290_v15  ;;  %637 = vmatpush3.msra.mxu0 %v193_v17 }
  0x37   : > { %657 = vmatprep.subr.mxu1 %v289_v18  ;;  %639 = vmatmul.mubr.msk.f32.vlgmr.msra.gmra.mxu0 %vm202_vm0, %v192_v19 }
  0x38   : > { %662 = vmatprep.subr.mxu0 %v392_v20  ;;  %658 = vmatpush3.msra.mxu1 %v289_v18 }
  0x39   : > { %659 = vmatprep.mubr.msk.f32.mxu1 %vm202_vm0, %v286_v21  ;;  %663 = vmatpush3.msra.mxu0 %v392_v20 }
  0x3a   : > { %660 = vmatmul.mubr.msk.f32.vlgmr.msra.gmra.mxu1 %vm202_vm0, %v287_v22  ;;  %664 = vmatprep.subr.mxu0 %v391_v23 }
  0x3b   : > { %680 = vmatprep.mubr.msk.f32.mxu0 %vm202_vm0, %v381_v24  ;;  %665 = vmatpush3.msra.mxu0 %v391_v23 }
  0x3c   : > { %666 = vmatprep.subr.mxu0 %v390_v25 }
  0x3d   : > { %667 = vmatpush3.msra.mxu0 %v390_v25 }
  0x3e   : > { %668 = vmatprep.subr.mxu0 %v389_v26 }
  0x3f   : > { %669 = vmatpush3.msra.mxu0 %v389_v26 }
  0x40   : > { %670 = vmatprep.subr.mxu0 %v388_v27 }
  0x41   : > { %671 = vmatpush3.msra.mxu0 %v388_v27 }
  0x42   : > { %672 = vmatprep.subr.mxu0 %v387_v28 }
  0x43   : > { %673 = vmatpush3.msra.mxu0 %v387_v28 }
  0x44   : > { %674 = vmatprep.subr.mxu0 %v386_v29 }
  0x45   : > { %675 = vmatpush3.msra.mxu0 %v386_v29 }
  0x46   : > { %676 = vmatprep.subr.mxu0 %v385_v30 }
  0x47   : > { %677 = vmatpush3.msra.mxu0 %v385_v30 }
  0x48   : > { %678 = vmatprep.subr.mxu0 %v384_v31 }
  0x49   : > { %679 = vmatpush3.msra.mxu0 %v384_v31 }
  0x4a   : > { %681 = vmatmul.mubr.msk.f32.vlgmr.msra.gmra.mxu0 %vm202_vm0, %v382_v32 }
  0xf7   : > { %v640_v33 = vpop.f32.mrf.mxu0 }
  0xf8   : > { %v285_v37 = vadd.f32 %v640_v33, %v574_v34 }
  0xf9   : > { %v275_v35 = vpop.f32.mrf.mxu0 }
  0xfa   : > { %v661_v36 = vpop.f32.mrf.mxu1  ;;  %v284_v38 = vadd.f32 %v574_v34, %v275_v35 }
  0xfb   : > { %v380_v40 = vadd.f32 %v661_v36, %v285_v37 }
  0xfc   : > { %v370_v39 = vpop.f32.mrf.mxu1 }
  0xfd   : > { %v379_v42 = vadd.f32 %v370_v39, %v284_v38 }
 0x10a   : > { %v682_v41 = vpop.f32.mrf.mxu0 }
 0x10b   : > { %v475_v43 = vadd.f32 %v682_v41, %v380_v40 }
 0x10c   : > { %v465_v44 = vpop.f32.mrf.mxu0 }
 0x10d   : > { %477 = vst [vmem:[%s178_s20 + $0x8] sm:$0xff] %v475_v43  ;;  %v474_v45 = vadd.f32 %v465_v44, %v379_v42 }
 0x10f   : > { %476 = vst [vmem:[%s178_s20] sm:$0xff] %v474_v45 }
 0x110   : > { %777 = shalt.err (!%p774_p0)
}
 0x111   : > { %s778_s6 = scalar_lea.hbm %s951_s28, 256  ;;  %s782_s9 = scalar_lea.hbm %s996_s3, 512 }
 0x112   : > { %p779_p1 = scmp.ne.s32.totalorder %s951_s28, %s778_s6  ;;  %p783_p4 = scmp.lt.s32.totalorder %s951_s28, %s996_s3 }
 0x113   : > { %p784_p7 = scmp.lt.s32.totalorder %s782_s9, %s778_s6 }
 0x114   : > { %p780_p2 = pnand %p779_p1, %p894_p5 }
 0x115   : > { %p785_p8 = por %p784_p7, %p783_p4 }
 0x116   : > { %p781_p3 = pneg %p780_p2 }
 0x118   : > { %p786_p6 = pnand %p785_p8, %p781_p3 }
 0x11a   : > { %789 = shalt.err (!%p786_p6)
}
 0x11b   : > { %s834_s17 = smov 128   ;;  %s835_s19 = smov 8  }
 0x11c   : > { %688 = dma.vmem_to_hbm [thread:$0]  (%p894_p5), %s946_s24, 256, %s951_s28, %s953_s29, %s834_s17, %s834_s17, %s835_s19  }
 0x11d PF: > { %p700_p9 = scmp.ge.s32.totalorder %s828_s15, 2  ;;  %s507_s20 = sand.u32 1, %s816_s12  }
 0x11e   : > { %p1000_p10 = scmp.ne.s32.totalorder %s998_s23, 0  ;;  %s508_s25 = scalar_lea.sflag [#allocation4], %s507_s20 }
 0x120   : > { %p695_p11 = pnand %p700_p9, %p1000_p10 }
 0x122   : > { %p696_p12 = pneg %p695_p11 }
 0x124   : > { %811 = dma.done.wait (%p696_p12), %s508_s25, 256  }
 0x125   : > { %813 = vsyncadd (%p696_p12), %s508_s25, 4294967040  ;;  %p14_p13 = scmp.ge.s32.totalorder %s881_s18, 4   ;;  %s1001_s12 = smov %s820_s13 }
 0x126   : > { %s1002_s13 = smov %s824_s14  ;;  %s1003_s14 = smov %s892_s21 }
 0x127   : > { %s1004_s15 = smov %s881_s18  ;;  %16 = sbr.rel (!%p14_p13) target bundleno = 4 (0x4), region = 74 }
 0x12c   :  { %513 = vsyncpa [#allocation3], 1 }
 0x12d   :  { %515 = vsyncpa [#allocation3 + $0x1], 1 }
 0x12e   :  { %516 = vsyncpa [#allocation4], 1 }
 0x12f   :  { %518 = vsyncpa [#allocation4 + $0x1], 1 }

</bundles_post_ra>
